<compile_context>
chip_gen: v6e
topology: v6e:2x2x1
jax: 0.10.0
libtpu: 0.0.40
codegen_flags: <defaults>
</compile_context>

<pallas_src>
import jax
import jax.numpy as jnp
from jax.experimental import pallas as pl
from jax.experimental.pallas import tpu as pltpu


def qnetwork_kernel(s_ref, a_ref, w1s_ref, w1a_ref, b1_ref,
                    w2_ref, b2_ref, w3_ref, b3_ref, o_ref):
    # fc1 (fused concat: [state | action] @ [w1_s ; w1_a]) + ReLU
    h1 = (jnp.dot(s_ref[...], w1s_ref[...], preferred_element_type=jnp.float32)
          + jnp.dot(a_ref[...], w1a_ref[...], preferred_element_type=jnp.float32)
          + b1_ref[...])
    h1 = jnp.maximum(h1, 0.0)

    # fc2 + ReLU
    h2 = jnp.dot(h1, w2_ref[...], preferred_element_type=jnp.float32) + b2_ref[...]
    h2 = jnp.maximum(h2, 0.0)

    # fc3 (out_features = 1): VPU multiply + lane reduce instead of MXU matmul
    # w3_ref is (1, 128) and broadcasts against h2 (TB, 128).
    q = jnp.sum(h2 * w3_ref[...], axis=-1, keepdims=True) + b3_ref[...]
    o_ref[...] = q


def qnetwork_forward(state, action, params, *, batch_tile=512):
    """state: (B, num_inputs), action: (B, num_actions) -> (B, 1). All f32."""
    w1, b1, w2, b2, w3, b3 = params
    state = state.astype(jnp.float32)
    action = action.astype(jnp.float32)

    num_inputs = state.shape[1]
    num_actions = action.shape[1]
    hidden1 = w1.shape[1]          # 256
    hidden2 = w2.shape[1]          # 128

    # Split fc1 weight so the concat happens implicitly inside the kernel.
    w1_s = w1[:num_inputs, :]                  # (num_inputs, 256)
    w1_a = w1[num_inputs:, :]                  # (num_actions, 256)
    w3_row = jnp.reshape(w3, (1, hidden2))     # (1, 128) — VPU broadcast row
    b3_mat = jnp.reshape(b3, (1, 1))           # (1, 1)

    B = state.shape[0]
    # Batch tile: multiple of 8 (sublane), big enough to hide per-step overhead,
    # but never larger than the (padded) batch itself.
    tb = min(batch_tile, max(8, ((B + 7) // 8) * 8))
    b_pad = pl.cdiv(B, tb) * tb
    if b_pad != B:
        pad = b_pad - B
        state = jnp.pad(state, ((0, pad), (0, 0)))
        action = jnp.pad(action, ((0, pad), (0, 0)))

    grid = (b_pad // tb,)

    # Batch-tiled activations; weights/biases resident (constant index_map).
    in_specs = [
        pl.BlockSpec((tb, num_inputs), lambda i: (i, 0)),        # state tile
        pl.BlockSpec((tb, num_actions), lambda i: (i, 0)),       # action tile
        pl.BlockSpec((num_inputs, hidden1), lambda i: (0, 0)),   # w1_s
        pl.BlockSpec((num_actions, hidden1), lambda i: (0, 0)),  # w1_a
        pl.BlockSpec((1, hidden1), lambda i: (0, 0)),            # b1
        pl.BlockSpec((hidden1, hidden2), lambda i: (0, 0)),      # w2
        pl.BlockSpec((1, hidden2), lambda i: (0, 0)),            # b2
        pl.BlockSpec((1, hidden2), lambda i: (0, 0)),            # w3 row
        pl.BlockSpec((1, 1), lambda i: (0, 0)),                  # b3
    ]
    out_specs = pl.BlockSpec((tb, 1), lambda i: (i, 0))

    out = pl.pallas_call(
        qnetwork_kernel,
        out_shape=jax.ShapeDtypeStruct((b_pad, 1), jnp.float32),
        grid=grid,
        in_specs=in_specs,
        out_specs=out_specs,
        compiler_params=pltpu.CompilerParams(
            dimension_semantics=("parallel",)),
    )(state, action, w1_s, w1_a, b1, w2, b2, w3_row, b3_mat)

    return out[:B]


def init_params(key, num_inputs, num_actions):
    """nn.Linear default init: U(-1/sqrt(fan_in), 1/sqrt(fan_in)).
    Weights stored as (in_features, out_features); biases as (1, out_features)."""
    dims = [(num_inputs + num_actions, 256), (256, 128), (128, 1)]
    params = []
    for (fan_in, fan_out) in dims:
        key, kw, kb = jax.random.split(key, 3)
        bound = 1.0 / jnp.sqrt(jnp.float32(fan_in))
        w = jax.random.uniform(kw, (fan_in, fan_out), jnp.float32, -bound, bound)
        b = jax.random.uniform(kb, (1, fan_out), jnp.float32, -bound, bound)
        params += [w, b]
    return tuple(params)


if __name__ == "__main__":
    key = jax.random.PRNGKey(0)
    batch, num_inputs, num_actions = 8, 8, 4

    k_params, k_state, k_action = jax.random.split(key, 3)
    params = init_params(k_params, num_inputs, num_actions)
    state = jax.random.normal(k_state, (batch, num_inputs), jnp.float32)
    action = jax.random.normal(k_action, (batch, num_actions), jnp.float32)

    q = qnetwork_forward(state, action, params)
    q = jax.block_until_ready(q)

    # Reference check in plain JAX (same math as the PyTorch module).
    w1, b1, w2, b2, w3, b3 = params
    x = jnp.concatenate([state, action], axis=1)
    ref = jnp.maximum(x @ w1 + b1, 0.0)
    ref = jnp.maximum(ref @ w2 + b2, 0.0)
    ref = ref @ w3 + b3

    assert q.shape == (batch, 1)
    assert jnp.allclose(q, ref, atol=1e-5, rtol=1e-5)

    print("KERNEL_OK")
</pallas_src>

<mosaic_0001>
module attributes {stable_mosaic.version = 11 : i64} {
  func.func @qnetwork_kernel(%arg0: i32, %arg1: memref<8x8xf32, #tpu.memory_space<vmem>>, %arg2: memref<8x4xf32, #tpu.memory_space<vmem>>, %arg3: memref<8x256xf32, #tpu.memory_space<vmem>>, %arg4: memref<4x256xf32, #tpu.memory_space<vmem>>, %arg5: memref<1x256xf32, #tpu.memory_space<vmem>>, %arg6: memref<256x128xf32, #tpu.memory_space<vmem>>, %arg7: memref<1x128xf32, #tpu.memory_space<vmem>>, %arg8: memref<1x128xf32, #tpu.memory_space<vmem>>, %arg9: memref<1x1xf32, #tpu.memory_space<vmem>>, %arg10: memref<8x1xf32, #tpu.memory_space<vmem>>) attributes {dimension_semantics = [#tpu.dimension_semantics<parallel>], iteration_bounds = array<i64: 1>, scalar_prefetch = 0 : i64, scratch_operands = 0 : i64, tpu.core_type = #tpu.core_type<tc>, window_params = [{transform_indices = @transform_0, window_bounds = array<i64: 8, 8>}, {transform_indices = @transform_1, window_bounds = array<i64: 8, 4>}, {pipeline_mode = #tpu.pipeline_mode<synchronous>, transform_indices = @transform_2, window_bounds = array<i64: 8, 256>}, {pipeline_mode = #tpu.pipeline_mode<synchronous>, transform_indices = @transform_3, window_bounds = array<i64: 4, 256>}, {pipeline_mode = #tpu.pipeline_mode<synchronous>, transform_indices = @transform_4, window_bounds = array<i64: 1, 256>}, {pipeline_mode = #tpu.pipeline_mode<synchronous>, transform_indices = @transform_5, window_bounds = array<i64: 256, 128>}, {pipeline_mode = #tpu.pipeline_mode<synchronous>, transform_indices = @transform_6, window_bounds = array<i64: 1, 128>}, {pipeline_mode = #tpu.pipeline_mode<synchronous>, transform_indices = @transform_7, window_bounds = array<i64: 1, 128>}, {pipeline_mode = #tpu.pipeline_mode<synchronous>, transform_indices = @transform_8, window_bounds = array<i64: 1, 1>}, {transform_indices = @transform_9, window_bounds = array<i64: 8, 1>}]} {
    %c0 = arith.constant 0 : index
    %c0_0 = arith.constant 0 : index
    %0 = vector.load %arg1[%c0, %c0_0] : memref<8x8xf32, #tpu.memory_space<vmem>>, vector<8x8xf32>
    %c0_1 = arith.constant 0 : index
    %c0_2 = arith.constant 0 : index
    %1 = vector.load %arg3[%c0_1, %c0_2] : memref<8x256xf32, #tpu.memory_space<vmem>>, vector<8x256xf32>
    %cst = arith.constant dense<0.000000e+00> : vector<8x256xf32>
    %2 = tpu.matmul %0, %1, %cst {dimension_numbers = #tpu.dot_dimension_numbers<[1], [0], [0], [1], [0, 0, 1, 1], [], []>} : vector<8x8xf32>, vector<8x256xf32>, vector<8x256xf32> -> vector<8x256xf32>
    %c0_3 = arith.constant 0 : index
    %c0_4 = arith.constant 0 : index
    %3 = vector.load %arg2[%c0_3, %c0_4] : memref<8x4xf32, #tpu.memory_space<vmem>>, vector<8x4xf32>
    %c0_5 = arith.constant 0 : index
    %c0_6 = arith.constant 0 : index
    %4 = vector.load %arg4[%c0_5, %c0_6] : memref<4x256xf32, #tpu.memory_space<vmem>>, vector<4x256xf32>
    %cst_7 = arith.constant dense<0.000000e+00> : vector<8x256xf32>
    %5 = tpu.matmul %3, %4, %cst_7 {dimension_numbers = #tpu.dot_dimension_numbers<[1], [0], [0], [1], [0, 0, 1, 1], [], []>} : vector<8x4xf32>, vector<4x256xf32>, vector<8x256xf32> -> vector<8x256xf32>
    %6 = arith.addf %2, %5 : vector<8x256xf32>
    %c0_8 = arith.constant 0 : index
    %c0_9 = arith.constant 0 : index
    %7 = vector.load %arg5[%c0_8, %c0_9] : memref<1x256xf32, #tpu.memory_space<vmem>>, vector<1x256xf32>
    %8 = vector.broadcast %7 : vector<1x256xf32> to vector<8x256xf32>
    %9 = arith.addf %6, %8 : vector<8x256xf32>
    %cst_10 = arith.constant 0.000000e+00 : f32
    %10 = vector.broadcast %cst_10 : f32 to vector<8x256xf32>
    %11 = arith.maximumf %9, %10 : vector<8x256xf32>
    %c0_11 = arith.constant 0 : index
    %c0_12 = arith.constant 0 : index
    %12 = vector.load %arg6[%c0_11, %c0_12] : memref<256x128xf32, #tpu.memory_space<vmem>>, vector<256x128xf32>
    %cst_13 = arith.constant dense<0.000000e+00> : vector<8x128xf32>
    %13 = tpu.matmul %11, %12, %cst_13 {dimension_numbers = #tpu.dot_dimension_numbers<[1], [0], [0], [1], [0, 0, 1, 1], [], []>} : vector<8x256xf32>, vector<256x128xf32>, vector<8x128xf32> -> vector<8x128xf32>
    %c0_14 = arith.constant 0 : index
    %c0_15 = arith.constant 0 : index
    %14 = vector.load %arg7[%c0_14, %c0_15] : memref<1x128xf32, #tpu.memory_space<vmem>>, vector<1x128xf32>
    %15 = vector.broadcast %14 : vector<1x128xf32> to vector<8x128xf32>
    %16 = arith.addf %13, %15 : vector<8x128xf32>
    %cst_16 = arith.constant 0.000000e+00 : f32
    %17 = vector.broadcast %cst_16 : f32 to vector<8x128xf32>
    %18 = arith.maximumf %16, %17 : vector<8x128xf32>
    %c0_17 = arith.constant 0 : index
    %c0_18 = arith.constant 0 : index
    %19 = vector.load %arg8[%c0_17, %c0_18] : memref<1x128xf32, #tpu.memory_space<vmem>>, vector<1x128xf32>
    %20 = vector.broadcast %19 : vector<1x128xf32> to vector<8x128xf32>
    %21 = arith.mulf %18, %20 : vector<8x128xf32>
    %cst_19 = arith.constant dense<0.000000e+00> : vector<8xf32>
    %22 = vector.multi_reduction <add>, %21, %cst_19 [1] : vector<8x128xf32> to vector<8xf32>
    %23 = vector.shape_cast %22 : vector<8xf32> to vector<8x1xf32>
    %c0_20 = arith.constant 0 : index
    %c0_21 = arith.constant 0 : index
    %24 = vector.load %arg9[%c0_20, %c0_21] : memref<1x1xf32, #tpu.memory_space<vmem>>, vector<1x1xf32>
    %25 = vector.broadcast %24 : vector<1x1xf32> to vector<8x1xf32>
    %26 = arith.addf %23, %25 : vector<8x1xf32>
    %c0_22 = arith.constant 0 : index
    %c0_23 = arith.constant 0 : index
    %27 = vector.load %arg10[%c0_22, %c0_23] : memref<8x1xf32, #tpu.memory_space<vmem>>, vector<8x1xf32>
    tpu.vector_store %arg10[%c0_22, %c0_23], %26 {strides = array<i32>} : memref<8x1xf32, #tpu.memory_space<vmem>>, vector<8x1xf32>,
    return
  }
  func.func @transform_0(%arg0: i32) -> (i32, i32) {
    %c0_i32 = arith.constant 0 : i32
    %c0_i32_0 = arith.constant 0 : i32
    return %arg0, %c0_i32 : i32, i32
  }
  func.func @transform_1(%arg0: i32) -> (i32, i32) {
    %c0_i32 = arith.constant 0 : i32
    %c0_i32_0 = arith.constant 0 : i32
    return %arg0, %c0_i32 : i32, i32
  }
  func.func @transform_2(%arg0: i32) -> (i32, i32) {
    %c0_i32 = arith.constant 0 : i32
    %c0_i32_0 = arith.constant 0 : i32
    %c0_i32_1 = arith.constant 0 : i32
    return %c0_i32, %c0_i32_0 : i32, i32
  }
  func.func @transform_3(%arg0: i32) -> (i32, i32) {
    %c0_i32 = arith.constant 0 : i32
    %c0_i32_0 = arith.constant 0 : i32
    %c0_i32_1 = arith.constant 0 : i32
    return %c0_i32, %c0_i32_0 : i32, i32
  }
  func.func @transform_4(%arg0: i32) -> (i32, i32) {
    %c0_i32 = arith.constant 0 : i32
    %c0_i32_0 = arith.constant 0 : i32
    %c0_i32_1 = arith.constant 0 : i32
    return %c0_i32, %c0_i32_0 : i32, i32
  }
  func.func @transform_5(%arg0: i32) -> (i32, i32) {
    %c0_i32 = arith.constant 0 : i32
    %c0_i32_0 = arith.constant 0 : i32
    %c0_i32_1 = arith.constant 0 : i32
    return %c0_i32, %c0_i32_0 : i32, i32
  }
  func.func @transform_6(%arg0: i32) -> (i32, i32) {
    %c0_i32 = arith.constant 0 : i32
    %c0_i32_0 = arith.constant 0 : i32
    %c0_i32_1 = arith.constant 0 : i32
    return %c0_i32, %c0_i32_0 : i32, i32
  }
  func.func @transform_7(%arg0: i32) -> (i32, i32) {
    %c0_i32 = arith.constant 0 : i32
    %c0_i32_0 = arith.constant 0 : i32
    %c0_i32_1 = arith.constant 0 : i32
    return %c0_i32, %c0_i32_0 : i32, i32
  }
  func.func @transform_8(%arg0: i32) -> (i32, i32) {
    %c0_i32 = arith.constant 0 : i32
    %c0_i32_0 = arith.constant 0 : i32
    %c0_i32_1 = arith.constant 0 : i32
    return %c0_i32, %c0_i32_0 : i32, i32
  }
  func.func @transform_9(%arg0: i32) -> (i32, i32) {
    %c0_i32 = arith.constant 0 : i32
    %c0_i32_0 = arith.constant 0 : i32
    return %arg0, %c0_i32 : i32, i32
  }
}

</mosaic_0001>

<bundles_post_ra>
// kernel: tpu_custom_call.1
= control target key start
LH: loop header
LB: loop body
LE: loop exit
PB: predicated region body
PF: predicated region fallthrough
CT: control target
= control target key end

     0   :  { %s587_s0 = inlined_call_operand.hbm [shape: f32[8,8], index: 0, kind: input, shape index: {}]   ;;  %s588_s1 = inlined_call_operand.vmem [shape: f32[8,4], index: 1, kind: input, shape index: {}]   ;;  %s589_s2 = inlined_call_operand.vmem [shape: f32[8,256], index: 2, kind: input, shape index: {}]   ;;  %s590_s3 = inlined_call_operand.hbm [shape: f32[4,256], index: 3, kind: input, shape index: {}]   ;;  %s591_s4 = inlined_call_operand.vmem [shape: f32[1,256], index: 4, kind: input, shape index: {}]   ;;  %s592_s5 = inlined_call_operand.hbm [shape: f32[256,128], index: 5, kind: input, shape index: {}]   ;;  %s593_s6 = inlined_call_operand.vmem [shape: f32[1,128], index: 6, kind: input, shape index: {}]   ;;  %s594_s7 = inlined_call_operand.vmem [shape: f32[1,128], index: 7, kind: input, shape index: {}]   ;;  %s595_s8 = inlined_call_operand.<no memory space> [shape: f32[1,1], index: 8, kind: input, shape index: {}]   ;;  %s596_s9 = inlined_call_operand.vmem [shape: f32[8,1], index: 9, kind: output, shape index: {}]  }
   0x1   :  { %v14_v0 = vstv %s595_s8 }
   0x2   :  { %15 = vst [vmem:[#allocation2] sm:$0x1] %v14_v0 }
   0x3   :  { %16 = vsyncpa [#allocation4], 0 }
   0x4   :  { %17 = vsyncpa [#allocation6], 0  ;;  %s498_s11 = smov [#allocation5]   ;;  %s499_s13 = smov [#allocation3]  }
   0x5   :  { %s38_s12 = sshll.u32 %s498_s11, 4  ;;  %s24_s14 = sshll.u32 %s499_s13, 4  ;;  %s39_s12 = int_to_ptr.vmem [resolvable:$true] %s38_s12  ;;  %s25_s14 = int_to_ptr.vmem [resolvable:$true] %s24_s14 }
   0x6   :  { %s442_s15 = scalar_lea.vmem %s39_s12, 128  ;;  %p447_p1 = scmp.lt.s32.totalorder %s39_s12, %s39_s12 }
   0x7   :  { %p443_p0 = scmp.ne.s32.totalorder %s39_s12, %s442_s15  ;;  %p448_p2 = scmp.lt.s32.totalorder %s442_s15, %s442_s15 }
   0x9   :  { %p449_p3 = por %p448_p2, %p447_p1 }
   0xb   :  { %p450_p4 = pnand %p449_p3, %p443_p0 }
   0xd   :  { %453 = shalt.err (!%p450_p4)
}
   0xe   :  { %41 = dma.hbm_to_vmem [thread:$0]  %s590_s3, 128, %s39_s12, [#allocation6]  }
   0xf   :  { %s462_s8 = scalar_lea.vmem %s25_s14, 128  ;;  %p467_p6 = scmp.lt.s32.totalorder %s25_s14, %s25_s14 }
  0x10   :  { %p463_p5 = scmp.ne.s32.totalorder %s25_s14, %s462_s8  ;;  %p468_p7 = scmp.lt.s32.totalorder %s462_s8, %s462_s8 }
  0x12   :  { %p469_p8 = por %p468_p7, %p467_p6 }
  0x14   :  { %p470_p9 = pnand %p469_p8, %p463_p5 }
  0x16   :  { %473 = shalt.err (!%p470_p9)
}
  0x17   :  { %27 = dma.hbm_to_vmem [thread:$0]  %s587_s0, 128, %s25_s14, [#allocation4]  }
  0x18   :  { %s500_s20 = smov [#allocation7]  }
  0x19   :  { %s49_s21 = sshll.u32 %s500_s20, 4  ;;  %s50_s21 = int_to_ptr.vmem [resolvable:$true] %s49_s21 }
  0x1a   :  { %s482_s22 = scalar_lea.vmem %s50_s21, 4096  ;;  %p487_p11 = scmp.lt.s32.totalorder %s50_s21, %s50_s21 }
  0x1b   :  { %p483_p10 = scmp.ne.s32.totalorder %s50_s21, %s482_s22  ;;  %p488_p12 = scmp.lt.s32.totalorder %s482_s22, %s482_s22 }
  0x1d   :  { %p489_p13 = por %p488_p12, %p487_p11 }
  0x1f   :  { %p490_p0 = pnand %p489_p13, %p483_p10 }
  0x21   :  { %493 = shalt.err (!%p490_p0)
}
  0x22   :  { %s501_s3 = smov 128   ;;  %s502_s23 = smov 8  }
  0x23   :  { %55 = dma.hbm_to_vmem [thread:$0]  %s592_s5, 4096, %s50_s21, [#allocation6], %s501_s3, %s501_s3, %s502_s23  }
  0x24   :  { %494 = dma.done.wait [#allocation4], 128  }
  0x25   :  { %495 = vsyncadd [#allocation4], 4294967168 }
  0x26   :  { %496 = dma.done.wait [#allocation6], 4224  }
  0x27   :  { %497 = vsyncadd [#allocation6], 4294963072  ;;  %v503_v1 = vmov 0.0   ;;  %v75_v2 = vld [vmem:[#allocation5] sm:$0xff]  ;;  %vm82_vm0 = vcmask 1043456   ;;  %v74_v4 = vld [vmem:[%s588_s1] sm:$0xff]  ;;  %v235_v40 = vlaneseq }
  0x28   :  { %151 = vmatprep.mubr.f32.mxu1 %v503_v1  ;;  %v77_v3 = vcombine.high %v75_v2, %v75_v2  ;;  %v280_v5 = vld [vmem:[#allocation7 + $0xf8] sm:$0xff]  ;;  %vm78_vm1 = vcmask 31744   ;;  %v279_v8 = vld [vmem:[#allocation7 + $0xf0] sm:$0xff]  ;;  %v278_v11 = vld [vmem:[#allocation7 + $0xe8] sm:$0xff]  ;;  %vm158_vm2 = vcmask 64512   ;;  %vm377_vm3 = vcmask 7168  }
  0x29   :  { %v73_v6 = vld [vmem:[%s589_s2 + $0x8] sm:$0xff]  ;;  %392 = vmatprep.subr.mxu0 %v280_v5  ;;  %v72_v9 = vld [vmem:[%s589_s2] sm:$0xff]  ;;  %v277_v14 = vld [vmem:[#allocation7 + $0xe0] sm:$0xff]  ;;  %v236_v41 = vshrl.u32 %v235_v40, 7 }
  0x2a   :  { %v264_v7 = vld [vmem:[#allocation7 + $0x78] sm:$0xff]  ;;  %385 = vmatprep.subr.msk.mxu1 %vm82_vm0, %v77_v3  ;;  %v263_v10 = vld [vmem:[#allocation7 + $0x70] sm:$0xff]  ;;  %v262_v13 = vld [vmem:[#allocation7 + $0x68] sm:$0xff] }
  0x2b   :  { %393 = vmatpush3.msra.mxu0 %v264_v7  ;;  %386 = vmatpush1.msk.msra.mxu1 %vm82_vm0, %v75_v2  ;;  %v71_v12 = vld [vmem:[#allocation3] sm:$0xff]  ;;  %v261_v15 = vld [vmem:[#allocation7 + $0x60] sm:$0xff]  ;;  %v276_v16 = vld [vmem:[#allocation7 + $0xd8] sm:$0xff]  ;;  %v237_v43 = vsub.s32 0, %v236_v41  ;;  %v241_v45 = vsub.s32 1, %v236_v41 }
  0x2c   :  { %394 = vmatprep.subr.mxu0 %v279_v8  ;;  %387 = vmatmul.mubr.msk.f32.vlgmr.msra.gmra.mxu1 %vm78_vm1, %v74_v4  ;;  %v260_v17 = vld [vmem:[#allocation7 + $0x58] sm:$0xff]  ;;  %v275_v18 = vld [vmem:[#allocation7 + $0xd0] sm:$0xff]  ;;  %v274_v20 = vld [vmem:[#allocation7 + $0xc8] sm:$0xff] }
  0x2d   :  { %192 = vmatprep.subr.mxu1 %v73_v6  ;;  %226 = vmatprep.mubr.f32.mxu1 %v503_v1  ;;  %v259_v19 = vld [vmem:[#allocation7 + $0x50] sm:$0xff]  ;;  %v258_v21 = vld [vmem:[#allocation7 + $0x48] sm:$0xff]  ;;  %v273_v22 = vld [vmem:[#allocation7 + $0xc0] sm:$0xff] }
  0x2e   :  { %193 = vmatpush1.msra.mxu1 %v72_v9  ;;  %395 = vmatpush3.msra.mxu0 %v263_v10  ;;  %v257_v23 = vld [vmem:[#allocation7 + $0x40] sm:$0xff]  ;;  %v272_v24 = vld [vmem:[#allocation7 + $0xb8] sm:$0xff]  ;;  %v271_v26 = vld [vmem:[#allocation7 + $0xb0] sm:$0xff] }
  0x2f   :  { %396 = vmatprep.subr.mxu0 %v278_v11  ;;  %v256_v25 = vld [vmem:[#allocation7 + $0x38] sm:$0xff]  ;;  %v255_v27 = vld [vmem:[#allocation7 + $0x30] sm:$0xff]  ;;  %v270_v28 = vld [vmem:[#allocation7 + $0xa8] sm:$0xff] }
  0x30   :  { %388 = vmatmul.mubr.msk.f32.vlgmr.msra.gmra.mxu1 %vm158_vm2, %v71_v12  ;;  %397 = vmatpush3.msra.mxu0 %v262_v13  ;;  %v254_v29 = vld [vmem:[#allocation7 + $0x28] sm:$0xff]  ;;  %v269_v30 = vld [vmem:[#allocation7 + $0xa0] sm:$0xff]  ;;  %v268_v32 = vld [vmem:[#allocation7 + $0x98] sm:$0xff] }
  0x31   :  { %398 = vmatprep.subr.mxu0 %v277_v14  ;;  %v253_v31 = vld [vmem:[#allocation7 + $0x20] sm:$0xff]  ;;  %v252_v33 = vld [vmem:[#allocation7 + $0x18] sm:$0xff]  ;;  %v267_v34 = vld [vmem:[#allocation7 + $0x90] sm:$0xff] }
  0x32   :  { %399 = vmatpush3.msra.mxu0 %v261_v15  ;;  %v251_v35 = vld [vmem:[#allocation7 + $0x10] sm:$0xff]  ;;  %v266_v36 = vld [vmem:[#allocation7 + $0x88] sm:$0xff]  ;;  %v265_v38 = vld [vmem:[#allocation7 + $0x80] sm:$0xff] }
  0x33   :  { %400 = vmatprep.subr.mxu0 %v276_v16  ;;  %v250_v37 = vld [vmem:[#allocation7 + $0x8] sm:$0xff]  ;;  %v249_v39 = vld [vmem:[#allocation7] sm:$0xff] }
  0x34   :  { %401 = vmatpush3.msra.mxu0 %v260_v17  ;;  %v233_v44 = vld [vmem:[%s591_s4] sm:$0x3] }
  0x35   :  { %402 = vmatprep.subr.mxu0 %v275_v18  ;;  %v238_v48 = vrot.slane %v233_v44, %v237_v43  ;;  %v242_v50 = vrot.slane %v233_v44, %v241_v45  ;;  %v389_v59 = vld [vmem:[%s593_s6] ss:$0 sm:$0xff] }
  0x36   :  { %403 = vmatpush3.msra.mxu0 %v259_v19  ;;  %v390_v62 = vld [vmem:[%s594_s7] ss:$0 sm:$0xff] }
  0x37   :  { %404 = vmatprep.subr.mxu0 %v274_v20  ;;  %v391_v1 = vld [vmem:[#allocation2] ss:$0 sm:$0xff] }
  0x38   :  { %405 = vmatpush3.msra.mxu0 %v258_v21 }
  0x39   :  { %406 = vmatprep.subr.mxu0 %v273_v22 }
  0x3a   :  { %407 = vmatpush3.msra.mxu0 %v257_v23 }
  0x3b   :  { %408 = vmatprep.subr.mxu0 %v272_v24 }
  0x3c   :  { %409 = vmatpush3.msra.mxu0 %v256_v25 }
  0x3d   :  { %410 = vmatprep.subr.mxu0 %v271_v26 }
  0x3e   :  { %411 = vmatpush3.msra.mxu0 %v255_v27 }
  0x3f   :  { %412 = vmatprep.subr.mxu0 %v270_v28 }
  0x40   :  { %413 = vmatpush3.msra.mxu0 %v254_v29 }
  0x41   :  { %414 = vmatprep.subr.mxu0 %v269_v30 }
  0x42   :  { %415 = vmatpush3.msra.mxu0 %v253_v31 }
  0x43   :  { %416 = vmatprep.subr.mxu0 %v268_v32 }
  0x44   :  { %417 = vmatpush3.msra.mxu0 %v252_v33 }
  0x45   :  { %418 = vmatprep.subr.mxu0 %v267_v34 }
  0x46   :  { %419 = vmatpush3.msra.mxu0 %v251_v35 }
  0x47   :  { %420 = vmatprep.subr.mxu0 %v266_v36 }
  0x48   :  { %421 = vmatpush3.msra.mxu0 %v250_v37 }
  0x49   :  { %422 = vmatprep.subr.mxu0 %v265_v38 }
  0x4a   :  { %423 = vmatpush3.msra.mxu0 %v249_v39 }
  0xec   :  { %v153_v42 = vpop.f32.mrf.mxu1 }
  0xee   :  { %v155_v46 = vpop.f32.mrf.mxu1 }
  0xf0   :  { %v228_v47 = vpop.f32.mrf.mxu1 }
  0xf1   :  { %v229_v49 = vadd.f32 %v228_v47, %v153_v42 }
  0xf2   :  { %v230_v51 = vpop.f32.mrf.mxu1 }
  0xf3   :  { %v231_v52 = vadd.f32 %v230_v51, %v155_v46  ;;  %v245_v53 = vadd.f32 %v238_v48, %v229_v49 }
  0xf5   :  { %v246_v54 = vadd.f32 %v242_v50, %v231_v52  ;;  %v247_v56 = vmax.f32 %v245_v53, 0.0 }
  0xf7   :  { %v248_v55 = vmax.f32 %v246_v54, 0.0 }
  0xf9   :  { %352 = vmatprep.mubr.f32.mxu0 %v248_v55 }
  0xfa   :  { %353 = vmatmul.mubr.f32.vlgmr.msra.gmra.mxu0 %v247_v56 }
 0x1ba   :  { %v424_v57 = vpop.f32.mrf.mxu0 }
 0x1bc   :  { %v425_v58 = vpop.f32.mrf.mxu0 }
 0x1bd   :  { %v426_v60 = vadd.f32 %v425_v58, %v424_v57 }
 0x1bf   :  { %v355_v61 = vadd.f32 %v426_v60, %v389_v59 }
 0x1c1   :  { %v358_v63 = vmax.f32 %v355_v61, 0.0 }
 0x1c3   :  { %v366_v0 = vmul.f32 %v390_v62, %v358_v63 }
 0x1c5   :  { %367 = vadd.xlane.f32.xlu0 %v366_v0 }
 0x24e   :  { %v368_v2 = vpop.xlane.xlu0 %367 }
 0x24f   :  { %v376_v3 = vadd.f32 %v391_v1, %v368_v2 }
 0x251   :  { %378 = vst.msk [vmem:[%s596_s9] sm:$0xff] %vm377_vm3, %v376_v3 }
 0x252   :  { %383 = vsyncpa [#allocation4], 1 }
 0x253   :  { %384 = vsyncpa [#allocation6], 1 }

</bundles_post_ra>
